<compile_context>
chip_gen: v5e
topology: v5e:2x2
jax: 0.10.0
libtpu: 0.0.40
codegen_flags: <defaults>
</compile_context>

<pallas_src>
import jax
import jax.numpy as jnp
from jax.experimental import pallas as pl
from jax.experimental.pallas import tpu as pltpu

LANE = 128      # vreg lane width (last-dim tiling granularity)
SUB = 16        # sublane multiple safe for both bf16 and f32 tiles


def _cdiv(a: int, b: int) -> int:
    return -(-a // b)


def _round_up(n: int, m: int) -> int:
    return _cdiv(n, m) * m


def _vmem_capacity_bytes() -> int:
    """Physical VMEM per TensorCore (generation aware), with a safe fallback."""
    try:
        cap = getattr(pltpu.get_tpu_info(), "vmem_capacity_bytes", None)
        if cap:
            return int(cap)
    except Exception:
        pass
    return 64 << 20          # conservative: v7x has 64 MiB per TensorCore


def _feature_pad_multiple() -> int:
    """Pad H/O to the MXU width: 256 on v6e/v7x (2x256x256 MXU), 128 otherwise."""
    try:
        kind = jax.devices()[0].device_kind.lower()
        if "v6" in kind or "v7" in kind:
            return 256
    except Exception:
        pass
    return LANE


def _choose_tk(Dp: int, block_k: int) -> int:
    """Largest multiple of LANE that divides Dp and is <= block_k."""
    nk = Dp // LANE
    t = max(1, min(block_k // LANE, nk))
    while nk % t:
        t -= 1
    return t * LANE


def _classifier_kernel(x_ref, w1_ref, b1_ref, w2_ref, b2_ref, o_ref, h_acc):
    """One (batch-tile, D-reduction-tile) grid step of fc2(SiLU(fc1(x)))."""
    k = pl.program_id(1)

    @pl.when(k == 0)
    def _init():
        h_acc[...] = jnp.zeros_like(h_acc)

    # fc1 partial product on the MXU, accumulated in f32.
    h_acc[...] += jnp.dot(x_ref[...], w1_ref[...],
                          preferred_element_type=jnp.float32)

    @pl.when(k == pl.num_programs(1) - 1)
    def _finalize():
        h = h_acc[...] + b1_ref[...]            # bias in f32
        h = h * jax.nn.sigmoid(h)               # SiLU in f32 (EUP sigmoid, VPU mul)
        o = jnp.dot(h.astype(w2_ref.dtype), w2_ref[...],
                    preferred_element_type=jnp.float32)
        o_ref[...] = (o + b2_ref[...]).astype(o_ref.dtype)   # lane-dense store


def prepare_classifier_params(w1, b1, w2, b2, *, compute_dtype=jnp.bfloat16,
                              feature_pad=None):
    """Pad + cast weights/biases ONCE, outside the per-call hot path.

    w1: [D, H], b1: [H], w2: [H, O], b2: [O]  (y = x @ W + b, i.e. PyTorch
    Linear weights transposed to [in, out]).  Zero padding is exact.
    """
    D, H = w1.shape
    O = w2.shape[1]
    if feature_pad is None:
        feature_pad = _feature_pad_multiple()
    compute_dtype = jnp.dtype(compute_dtype)

    Dp = _round_up(D, LANE)       # D stays 128-granular so x can go unpadded
    Hp = _round_up(H, feature_pad)
    Op = _round_up(O, feature_pad)

    w1_p = jnp.zeros((Dp, Hp), compute_dtype).at[:D, :H].set(w1.astype(compute_dtype))
    w2_p = jnp.zeros((Hp, Op), compute_dtype).at[:H, :O].set(w2.astype(compute_dtype))
    # Biases stay f32 ([1, N] rows broadcasting over the batch tile).
    b1_p = jnp.zeros((1, Hp), jnp.float32).at[0, :H].set(b1.astype(jnp.float32))
    b2_p = jnp.zeros((1, Op), jnp.float32).at[0, :O].set(b2.astype(jnp.float32))

    return {"w1": w1_p, "b1": b1_p, "w2": w2_p, "b2": b2_p,
            "dims": (D, H, O), "compute_dtype": compute_dtype}


def classifier_apply(params, x, *, block_m=None, block_k=512, out_dtype=None):
    """fc2(SiLU(fc1(x))) with pre-padded params.  x: [B, D] -> [B, O]."""
    D, H, O = params["dims"]
    w1_p, b1_p, w2_p, b2_p = params["w1"], params["b1"], params["w2"], params["b2"]
    compute_dtype = params["compute_dtype"]
    Dp, Hp = w1_p.shape
    Op = w2_p.shape[1]

    B, Dx = x.shape
    assert Dx == D, f"x feature dim {Dx} != weight input dim {D}"

    out_dtype = jnp.dtype(x.dtype if out_dtype is None else out_dtype)

    # ---- generation-aware VMEM budget & tile defaults ----
    vmem_cap = _vmem_capacity_bytes()
    vmem_target = int(vmem_cap * 0.85)        # leave Mosaic headroom (esp. v7x)
    if block_m is None:
        # 512-wide batch tiles on v5e/v6e (128 MiB VMEM), 256 on v7x (64 MiB).
        block_m = 512 if vmem_cap >= (96 << 20) else 256

    # ---- reduction (fc1-K) tiling over D ----
    tk = _choose_tk(Dp, max(LANE, block_k))

    # ---- cdiv-correct batch tiling; force >=2 tiles when B allows so v7x can
    #      shard the "parallel" axis across both TensorCores and the pipeline
    #      has more than one step ----
    n_tiles = _cdiv(B, block_m)
    if B > SUB:
        n_tiles = max(n_tiles, 2)
    bm = _round_up(_cdiv(B, n_tiles), SUB)

    # ---- VMEM estimate incl. in-kernel intermediates; shrink bm / tk to fit ----
    c_item = compute_dtype.itemsize
    o_item = out_dtype.itemsize

    def vmem_estimate(bm_, tk_):
        return (
            2 * bm_ * tk_ * c_item            # x tile (double-buffered)
            + 2 * tk_ * Hp * c_item           # w1 tile(s) (worst-case 2 buffers)
            + 2 * Hp * Op * c_item            # w2 resident (worst-case 2 buffers)
            + 2 * (Hp + Op) * 4               # f32 biases
            + 2 * bm_ * Op * o_item           # out tile (double-buffered)
            + bm_ * Hp * 4                    # f32 hidden accumulator (scratch)
            + bm_ * Hp * (4 + c_item)         # SiLU temp + MXU-dtype cast copy
            + bm_ * Op * 4                    # f32 fc2 result before output cast
            + (4 << 20)                       # Mosaic internal scratch headroom
        )

    while vmem_estimate(bm, tk) > vmem_target and bm > SUB:
        bm = max(SUB, _round_up(bm // 2, SUB))
    while vmem_estimate(bm, tk) > vmem_target and tk > LANE:
        tk = _choose_tk(Dp, tk // 2)
    # TODO(synk): if w2 / the hidden row still exceed VMEM (very large H*O), add
    # an H-tiled reduction for fc2 instead of keeping w2 and h fully resident.

    grid_m = _cdiv(B, bm)
    grid_k = Dp // tk
    Bp = grid_m * bm
    vmem_limit = int(min(max(vmem_estimate(bm, tk), 16 << 20), vmem_target))

    # ---- minimal x padding: only pad the dims that actually need it ----
    x_in = x if x.dtype == compute_dtype else x.astype(compute_dtype)
    pad_b, pad_d = Bp - B, Dp - D
    if pad_b or pad_d:
        x_in = jnp.pad(x_in, ((0, pad_b), (0, pad_d)))

    def build_call(single_buffer_consts):
        def const_spec(shape):
            if single_buffer_consts:
                return pl.BlockSpec(shape, lambda i, k: (0, 0),
                                    pipeline_mode=pl.Buffered(1))
            return pl.BlockSpec(shape, lambda i, k: (0, 0))

        w1_spec = (const_spec((tk, Hp)) if grid_k == 1
                   else pl.BlockSpec((tk, Hp), lambda i, k: (k, 0)))

        return pl.pallas_call(
            _classifier_kernel,
            out_shape=jax.ShapeDtypeStruct((Bp, Op), out_dtype),
            grid_spec=pltpu.PrefetchScalarGridSpec(
                num_scalar_prefetch=0,
                grid=(grid_m, grid_k),                     # reduction axis last
                in_specs=[
                    pl.BlockSpec((bm, tk), lambda i, k: (i, k)),   # x (pipelined)
                    w1_spec,                                        # w1
                    const_spec((1, Hp)),                            # b1
                    const_spec((Hp, Op)),                           # w2
                    const_spec((1, Op)),                            # b2
                ],
                out_specs=pl.BlockSpec((bm, Op), lambda i, k: (i, 0)),
                scratch_shapes=[pltpu.VMEM((bm, Hp), jnp.float32)],
            ),
            compiler_params=pltpu.CompilerParams(
                dimension_semantics=("parallel", "arbitrary"),
                vmem_limit_bytes=vmem_limit,
            ),
        )

    args = (x_in, w1_p, b1_p, w2_p, b2_p)
    try:
        # Single-buffer the constant-index operands: halves their VMEM footprint.
        out_p = build_call(True)(*args)
    except Exception:
        # pl.Buffered(1) rejected by this jax version -> default double-buffering.
        out_p = build_call(False)(*args)

    return out_p[:B, :O]          # strip batch / feature padding


def classifier_forward(x, w1, b1, w2, b2, *, compute_dtype=jnp.bfloat16,
                       feature_pad=None, **apply_kwargs):
    """One-shot convenience wrapper.  For repeated calls, call
    prepare_classifier_params(...) once and classifier_apply(...) per call so
    weight padding/casting stays off the per-call HBM path."""
    params = prepare_classifier_params(w1, b1, w2, b2,
                                       compute_dtype=compute_dtype,
                                       feature_pad=feature_pad)
    return classifier_apply(params, x, **apply_kwargs)


if __name__ == "__main__":
    key = jax.random.PRNGKey(0)

    def make_problem(k, B, D, H, O):
        kx, kw1, kb1, kw2, kb2 = jax.random.split(k, 5)
        x = jax.random.normal(kx, (B, D), jnp.float32)
        lim1 = 1.0 / (D ** 0.5)
        w1 = jax.random.uniform(kw1, (D, H), jnp.float32, -lim1, lim1)
        b1 = jax.random.uniform(kb1, (H,), jnp.float32, -lim1, lim1)
        lim2 = 1.0 / (H ** 0.5)
        w2 = jax.random.uniform(kw2, (H, O), jnp.float32, -lim2, lim2)
        b2 = jax.random.uniform(kb2, (O,), jnp.float32, -lim2, lim2)
        return x, w1, b1, w2, b2

    def reference(x, w1, b1, w2, b2):
        hp = jax.lax.Precision.HIGHEST
        h = jnp.dot(x, w1, precision=hp) + b1
        h = h * jax.nn.sigmoid(h)
        return jnp.dot(h, w2, precision=hp) + b2

    k_small, k_large = jax.random.split(key)

    # 1) Module-sized problem: batch=8, input_dim=32, hidden_dim=64, output_dim=16.
    x, w1, b1, w2, b2 = make_problem(k_small, 8, 32, 64, 16)
    ref = reference(x, w1, b1, w2, b2)

    # 1a) strict path: f32 MXU operands.
    out_f32 = jax.block_until_ready(
        classifier_forward(x, w1, b1, w2, b2, compute_dtype=jnp.float32))
    assert out_f32.shape == (8, 16)
    assert jnp.allclose(out_f32, ref, atol=2e-2, rtol=2e-2), "f32 path mismatch"

    # 1b) default fast path: bf16 MXU operands, f32 accumulation, padding hoisted.
    params = prepare_classifier_params(w1, b1, w2, b2)
    out_bf16 = jax.block_until_ready(classifier_apply(params, x))
    assert out_bf16.shape == (8, 16)
    assert jnp.allclose(out_bf16, ref, atol=6e-2, rtol=6e-2), "bf16 path mismatch"

    # 2) Larger problem exercising the K-tiled reduction over D (grid_k=4) and
    #    the multi-tile batch axis (grid_m>=2).
    xL, w1L, b1L, w2L, b2L = make_problem(k_large, 64, 512, 256, 128)
    refL = reference(xL, w1L, b1L, w2L, b2L)
    paramsL = prepare_classifier_params(w1L, b1L, w2L, b2L)
    outL = jax.block_until_ready(classifier_apply(paramsL, xL, block_k=128))
    assert outL.shape == (64, 128)
    assert jnp.allclose(outL, refL, atol=6e-2, rtol=6e-2), "K-tiled path mismatch"

    print("KERNEL_OK")
</pallas_src>

<mosaic_0001>
module attributes {stable_mosaic.version = 11 : i64} {
  func.func @_classifier_kernel(%arg0: i32, %arg1: i32, %arg2: memref<16x128xf32, #tpu.memory_space<vmem>>, %arg3: memref<128x128xf32, #tpu.memory_space<vmem>>, %arg4: memref<1x128xf32, #tpu.memory_space<vmem>>, %arg5: memref<128x128xf32, #tpu.memory_space<vmem>>, %arg6: memref<1x128xf32, #tpu.memory_space<vmem>>, %arg7: memref<16x128xf32, #tpu.memory_space<vmem>>, %arg8: memref<16x128xf32, #tpu.memory_space<vmem>>) attributes {dimension_semantics = [#tpu.dimension_semantics<parallel>, #tpu.dimension_semantics<arbitrary>], iteration_bounds = array<i64: 1, 1>, scalar_prefetch = 0 : i64, scratch_operands = 1 : i64, tpu.core_type = #tpu.core_type<tc>, window_params = [{transform_indices = @transform_0, window_bounds = array<i64: 16, 128>}, {pipeline_mode = #tpu.pipeline_mode<synchronous>, transform_indices = @transform_1, window_bounds = array<i64: 128, 128>}, {pipeline_mode = #tpu.pipeline_mode<synchronous>, transform_indices = @transform_2, window_bounds = array<i64: 1, 128>}, {pipeline_mode = #tpu.pipeline_mode<synchronous>, transform_indices = @transform_3, window_bounds = array<i64: 128, 128>}, {pipeline_mode = #tpu.pipeline_mode<synchronous>, transform_indices = @transform_4, window_bounds = array<i64: 1, 128>}, {transform_indices = @transform_5, window_bounds = array<i64: 16, 128>}]} {
    %c0_i32 = arith.constant 0 : i32
    %0 = arith.cmpi eq, %arg1, %c0_i32 : i32
    %1 = arith.extui %0 : i1 to i32
    %c0_i32_0 = arith.constant 0 : i32
    %2 = arith.cmpi ne, %1, %c0_i32_0 : i32
    scf.if %2 {
      %cst_10 = arith.constant 0.000000e+00 : f32
      %12 = vector.broadcast %cst_10 : f32 to vector<16x128xf32>
      %c0_11 = arith.constant 0 : index
      %c0_12 = arith.constant 0 : index
      %13 = vector.load %arg8[%c0_11, %c0_12] : memref<16x128xf32, #tpu.memory_space<vmem>>, vector<16x128xf32>
      tpu.vector_store %arg8[%c0_11, %c0_12], %12 {strides = array<i32>} : memref<16x128xf32, #tpu.memory_space<vmem>>, vector<16x128xf32>,
    } else {
    }
    %c0 = arith.constant 0 : index
    %c0_1 = arith.constant 0 : index
    %3 = vector.load %arg8[%c0, %c0_1] : memref<16x128xf32, #tpu.memory_space<vmem>>, vector<16x128xf32>
    %c0_2 = arith.constant 0 : index
    %c0_3 = arith.constant 0 : index
    %4 = vector.load %arg2[%c0_2, %c0_3] : memref<16x128xf32, #tpu.memory_space<vmem>>, vector<16x128xf32>
    %c0_4 = arith.constant 0 : index
    %c0_5 = arith.constant 0 : index
    %5 = vector.load %arg3[%c0_4, %c0_5] : memref<128x128xf32, #tpu.memory_space<vmem>>, vector<128x128xf32>
    %cst = arith.constant dense<0.000000e+00> : vector<16x128xf32>
    %6 = tpu.matmul %4, %5, %cst {dimension_numbers = #tpu.dot_dimension_numbers<[1], [0], [0], [1], [0, 0, 1, 1], [], []>} : vector<16x128xf32>, vector<128x128xf32>, vector<16x128xf32> -> vector<16x128xf32>
    %7 = arith.addf %3, %6 : vector<16x128xf32>
    %c0_6 = arith.constant 0 : index
    %c0_7 = arith.constant 0 : index
    %8 = vector.load %arg8[%c0_6, %c0_7] : memref<16x128xf32, #tpu.memory_space<vmem>>, vector<16x128xf32>
    tpu.vector_store %arg8[%c0_6, %c0_7], %7 {strides = array<i32>} : memref<16x128xf32, #tpu.memory_space<vmem>>, vector<16x128xf32>,
    %c0_i32_8 = arith.constant 0 : i32
    %9 = arith.cmpi eq, %arg1, %c0_i32_8 : i32
    %10 = arith.extui %9 : i1 to i32
    %c0_i32_9 = arith.constant 0 : i32
    %11 = arith.cmpi ne, %10, %c0_i32_9 : i32
    scf.if %11 {
      %c0_10 = arith.constant 0 : index
      %c0_11 = arith.constant 0 : index
      %12 = vector.load %arg8[%c0_10, %c0_11] : memref<16x128xf32, #tpu.memory_space<vmem>>, vector<16x128xf32>
      %c0_12 = arith.constant 0 : index
      %c0_13 = arith.constant 0 : index
      %13 = vector.load %arg4[%c0_12, %c0_13] : memref<1x128xf32, #tpu.memory_space<vmem>>, vector<1x128xf32>
      %14 = vector.broadcast %13 : vector<1x128xf32> to vector<16x128xf32>
      %15 = arith.addf %12, %14 : vector<16x128xf32>
      %16 = arith.negf %15 : vector<16x128xf32>
      %17 = math.exp %16 : vector<16x128xf32>
      %cst_14 = arith.constant 1.000000e+00 : f32
      %18 = vector.broadcast %cst_14 : f32 to vector<16x128xf32>
      %19 = arith.addf %18, %17 : vector<16x128xf32>
      %20 = arith.divf %18, %19 : vector<16x128xf32>
      %21 = arith.mulf %15, %20 : vector<16x128xf32>
      %c0_15 = arith.constant 0 : index
      %c0_16 = arith.constant 0 : index
      %22 = vector.load %arg5[%c0_15, %c0_16] : memref<128x128xf32, #tpu.memory_space<vmem>>, vector<128x128xf32>
      %cst_17 = arith.constant dense<0.000000e+00> : vector<16x128xf32>
      %23 = tpu.matmul %21, %22, %cst_17 {dimension_numbers = #tpu.dot_dimension_numbers<[1], [0], [0], [1], [0, 0, 1, 1], [], []>} : vector<16x128xf32>, vector<128x128xf32>, vector<16x128xf32> -> vector<16x128xf32>
      %c0_18 = arith.constant 0 : index
      %c0_19 = arith.constant 0 : index
      %24 = vector.load %arg6[%c0_18, %c0_19] : memref<1x128xf32, #tpu.memory_space<vmem>>, vector<1x128xf32>
      %25 = vector.broadcast %24 : vector<1x128xf32> to vector<16x128xf32>
      %26 = arith.addf %23, %25 : vector<16x128xf32>
      %c0_20 = arith.constant 0 : index
      %c0_21 = arith.constant 0 : index
      %27 = vector.load %arg7[%c0_20, %c0_21] : memref<16x128xf32, #tpu.memory_space<vmem>>, vector<16x128xf32>
      tpu.vector_store %arg7[%c0_20, %c0_21], %26 {strides = array<i32>} : memref<16x128xf32, #tpu.memory_space<vmem>>, vector<16x128xf32>,
    } else {
    }
    return
  }
  func.func @transform_0(%arg0: i32, %arg1: i32) -> (i32, i32) {
    %c0_i32 = arith.constant 0 : i32
    return %arg0, %arg1 : i32, i32
  }
  func.func @transform_1(%arg0: i32, %arg1: i32) -> (i32, i32) {
    %c0_i32 = arith.constant 0 : i32
    %c0_i32_0 = arith.constant 0 : i32
    %c0_i32_1 = arith.constant 0 : i32
    return %c0_i32, %c0_i32_0 : i32, i32
  }
  func.func @transform_2(%arg0: i32, %arg1: i32) -> (i32, i32) {
    %c0_i32 = arith.constant 0 : i32
    %c0_i32_0 = arith.constant 0 : i32
    %c0_i32_1 = arith.constant 0 : i32
    return %c0_i32, %c0_i32_0 : i32, i32
  }
  func.func @transform_3(%arg0: i32, %arg1: i32) -> (i32, i32) {
    %c0_i32 = arith.constant 0 : i32
    %c0_i32_0 = arith.constant 0 : i32
    %c0_i32_1 = arith.constant 0 : i32
    return %c0_i32, %c0_i32_0 : i32, i32
  }
  func.func @transform_4(%arg0: i32, %arg1: i32) -> (i32, i32) {
    %c0_i32 = arith.constant 0 : i32
    %c0_i32_0 = arith.constant 0 : i32
    %c0_i32_1 = arith.constant 0 : i32
    return %c0_i32, %c0_i32_0 : i32, i32
  }
  func.func @transform_5(%arg0: i32, %arg1: i32) -> (i32, i32) {
    %c0_i32 = arith.constant 0 : i32
    %c0_i32_0 = arith.constant 0 : i32
    return %arg0, %c0_i32 : i32, i32
  }
}

module attributes {stable_mosaic.version = 11 : i64} {
  func.func @_classifier_kernel(%arg0: i32, %arg1: i32, %arg2: memref<16x128xf32, #tpu.memory_space<vmem>>, %arg3: memref<128x128xf32, #tpu.memory_space<vmem>>, %arg4: memref<1x128xf32, #tpu.memory_space<vmem>>, %arg5: memref<128x128xf32, #tpu.memory_space<vmem>>, %arg6: memref<1x128xf32, #tpu.memory_space<vmem>>, %arg7: memref<16x128xf32, #tpu.memory_space<vmem>>, %arg8: memref<16x128xf32, #tpu.memory_space<vmem>>) attributes {dimension_semantics = [#tpu.dimension_semantics<parallel>, #tpu.dimension_semantics<arbitrary>], iteration_bounds = array<i64: 1, 1>, scalar_prefetch = 0 : i64, scratch_operands = 1 : i64, tpu.core_type = #tpu.core_type<tc>, window_params = [{transform_indices = @transform_0, window_bounds = array<i64: 16, 128>}, {pipeline_mode = #tpu.pipeline_mode<synchronous>, transform_indices = @transform_1, window_bounds = array<i64: 128, 128>}, {pipeline_mode = #tpu.pipeline_mode<synchronous>, transform_indices = @transform_2, window_bounds = array<i64: 1, 128>}, {pipeline_mode = #tpu.pipeline_mode<synchronous>, transform_indices = @transform_3, window_bounds = array<i64: 128, 128>}, {pipeline_mode = #tpu.pipeline_mode<synchronous>, transform_indices = @transform_4, window_bounds = array<i64: 1, 128>}, {transform_indices = @transform_5, window_bounds = array<i64: 16, 128>}]} {
    %c0_i32 = arith.constant 0 : i32
    %0 = arith.cmpi eq, %arg1, %c0_i32 : i32
    %1 = arith.extui %0 : i1 to i32
    %c0_i32_0 = arith.constant 0 : i32
    %2 = arith.cmpi ne, %1, %c0_i32_0 : i32
    scf.if %2 {
      %cst_10 = arith.constant 0.000000e+00 : f32
      %12 = vector.broadcast %cst_10 : f32 to vector<16x128xf32>
      %c0_11 = arith.constant 0 : index
      %c0_12 = arith.constant 0 : index
      %13 = vector.load %arg8[%c0_11, %c0_12] : memref<16x128xf32, #tpu.memory_space<vmem>>, vector<16x128xf32>
      tpu.vector_store %arg8[%c0_11, %c0_12], %12 {strides = array<i32>} : memref<16x128xf32, #tpu.memory_space<vmem>>, vector<16x128xf32>,
    } else {
    }
    %c0 = arith.constant 0 : index
    %c0_1 = arith.constant 0 : index
    %3 = vector.load %arg8[%c0, %c0_1] : memref<16x128xf32, #tpu.memory_space<vmem>>, vector<16x128xf32>
    %c0_2 = arith.constant 0 : index
    %c0_3 = arith.constant 0 : index
    %4 = vector.load %arg2[%c0_2, %c0_3] : memref<16x128xf32, #tpu.memory_space<vmem>>, vector<16x128xf32>
    %c0_4 = arith.constant 0 : index
    %c0_5 = arith.constant 0 : index
    %5 = vector.load %arg3[%c0_4, %c0_5] : memref<128x128xf32, #tpu.memory_space<vmem>>, vector<128x128xf32>
    %cst = arith.constant dense<0.000000e+00> : vector<16x128xf32>
    %6 = tpu.matmul %4, %5, %cst {dimension_numbers = #tpu.dot_dimension_numbers<[1], [0], [0], [1], [0, 0, 1, 1], [], []>} : vector<16x128xf32>, vector<128x128xf32>, vector<16x128xf32> -> vector<16x128xf32>
    %7 = arith.addf %3, %6 : vector<16x128xf32>
    %c0_6 = arith.constant 0 : index
    %c0_7 = arith.constant 0 : index
    %8 = vector.load %arg8[%c0_6, %c0_7] : memref<16x128xf32, #tpu.memory_space<vmem>>, vector<16x128xf32>
    tpu.vector_store %arg8[%c0_6, %c0_7], %7 {strides = array<i32>} : memref<16x128xf32, #tpu.memory_space<vmem>>, vector<16x128xf32>,
    %c0_i32_8 = arith.constant 0 : i32
    %9 = arith.cmpi eq, %arg1, %c0_i32_8 : i32
    %10 = arith.extui %9 : i1 to i32
    %c0_i32_9 = arith.constant 0 : i32
    %11 = arith.cmpi ne, %10, %c0_i32_9 : i32
    scf.if %11 {
      %c0_10 = arith.constant 0 : index
      %c0_11 = arith.constant 0 : index
      %12 = vector.load %arg8[%c0_10, %c0_11] : memref<16x128xf32, #tpu.memory_space<vmem>>, vector<16x128xf32>
      %c0_12 = arith.constant 0 : index
      %c0_13 = arith.constant 0 : index
      %13 = vector.load %arg4[%c0_12, %c0_13] : memref<1x128xf32, #tpu.memory_space<vmem>>, vector<1x128xf32>
      %14 = vector.broadcast %13 : vector<1x128xf32> to vector<16x128xf32>
      %15 = arith.addf %12, %14 : vector<16x128xf32>
      %16 = arith.negf %15 : vector<16x128xf32>
      %17 = math.exp %16 : vector<16x128xf32>
      %cst_14 = arith.constant 1.000000e+00 : f32
      %18 = vector.broadcast %cst_14 : f32 to vector<16x128xf32>
      %19 = arith.addf %18, %17 : vector<16x128xf32>
      %20 = arith.divf %18, %19 : vector<16x128xf32>
      %21 = arith.mulf %15, %20 : vector<16x128xf32>
      %c0_15 = arith.constant 0 : index
      %c0_16 = arith.constant 0 : index
      %22 = vector.load %arg5[%c0_15, %c0_16] : memref<128x128xf32, #tpu.memory_space<vmem>>, vector<128x128xf32>
      %cst_17 = arith.constant dense<0.000000e+00> : vector<16x128xf32>
      %23 = tpu.matmul %21, %22, %cst_17 {dimension_numbers = #tpu.dot_dimension_numbers<[1], [0], [0], [1], [0, 0, 1, 1], [], []>} : vector<16x128xf32>, vector<128x128xf32>, vector<16x128xf32> -> vector<16x128xf32>
      %c0_18 = arith.constant 0 : index
      %c0_19 = arith.constant 0 : index
      %24 = vector.load %arg6[%c0_18, %c0_19] : memref<1x128xf32, #tpu.memory_space<vmem>>, vector<1x128xf32>
      %25 = vector.broadcast %24 : vector<1x128xf32> to vector<16x128xf32>
      %26 = arith.addf %23, %25 : vector<16x128xf32>
      %c0_20 = arith.constant 0 : index
      %c0_21 = arith.constant 0 : index
      %27 = vector.load %arg7[%c0_20, %c0_21] : memref<16x128xf32, #tpu.memory_space<vmem>>, vector<16x128xf32>
      tpu.vector_store %arg7[%c0_20, %c0_21], %26 {strides = array<i32>} : memref<16x128xf32, #tpu.memory_space<vmem>>, vector<16x128xf32>,
    } else {
    }
    return
  }
  func.func @transform_0(%arg0: i32, %arg1: i32) -> (i32, i32) {
    %c0_i32 = arith.constant 0 : i32
    return %arg0, %arg1 : i32, i32
  }
  func.func @transform_1(%arg0: i32, %arg1: i32) -> (i32, i32) {
    %c0_i32 = arith.constant 0 : i32
    %c0_i32_0 = arith.constant 0 : i32
    %c0_i32_1 = arith.constant 0 : i32
    return %c0_i32, %c0_i32_0 : i32, i32
  }
  func.func @transform_2(%arg0: i32, %arg1: i32) -> (i32, i32) {
    %c0_i32 = arith.constant 0 : i32
    %c0_i32_0 = arith.constant 0 : i32
    %c0_i32_1 = arith.constant 0 : i32
    return %c0_i32, %c0_i32_0 : i32, i32
  }
  func.func @transform_3(%arg0: i32, %arg1: i32) -> (i32, i32) {
    %c0_i32 = arith.constant 0 : i32
    %c0_i32_0 = arith.constant 0 : i32
    %c0_i32_1 = arith.constant 0 : i32
    return %c0_i32, %c0_i32_0 : i32, i32
  }
  func.func @transform_4(%arg0: i32, %arg1: i32) -> (i32, i32) {
    %c0_i32 = arith.constant 0 : i32
    %c0_i32_0 = arith.constant 0 : i32
    %c0_i32_1 = arith.constant 0 : i32
    return %c0_i32, %c0_i32_0 : i32, i32
  }
  func.func @transform_5(%arg0: i32, %arg1: i32) -> (i32, i32) {
    %c0_i32 = arith.constant 0 : i32
    %c0_i32_0 = arith.constant 0 : i32
    return %arg0, %c0_i32 : i32, i32
  }
}

</mosaic_0001>

<bundles_post_ra>
// kernel: tpu_custom_call.1
= control target key start
LH: loop header
LB: loop body
LE: loop exit
PB: predicated region body
PF: predicated region fallthrough
CT: control target
= control target key end

     0   :  { %10 = vsyncpa [#allocation4], 0  ;;  %s455_s0 = inlined_call_operand.hbm [shape: f32[16,128], index: 0, kind: input, shape index: {}]   ;;  %s456_s1 = inlined_call_operand.hbm [shape: f32[128,128], index: 1, kind: input, shape index: {}]   ;;  %s457_s2 = inlined_call_operand.vmem [shape: f32[1,128], index: 2, kind: input, shape index: {}]   ;;  %s458_s3 = inlined_call_operand.hbm [shape: f32[128,128], index: 3, kind: input, shape index: {}]   ;;  %s459_s4 = inlined_call_operand.vmem [shape: f32[1,128], index: 4, kind: input, shape index: {}]   ;;  %s460_s5 = inlined_call_operand.hbm [shape: f32[16,128], index: 5, kind: output, shape index: {}]  }
   0x1   :  { %11 = vsyncpa [#allocation7], 0 }
   0x2   :  { %12 = vsyncpa [#allocation5], 0  ;;  %s30_s20 = sshll.u32 %s456_s1, 4  ;;  %s389_s21 = smov [#allocation6]   ;;  %s31_s20 = int_to_ptr.hbm [resolvable:$true] %s30_s20 }
   0x3   :  { %s32_s22 = sshll.u32 %s389_s21, 4  ;;  %s17_s25 = sshll.u32 %s455_s0, 4  ;;  %s33_s22 = int_to_ptr.vmem [resolvable:$true] %s32_s22  ;;  %s18_s25 = int_to_ptr.hbm [resolvable:$true] %s17_s25 }
   0x4   :  { %s390_s26 = smov 128   ;;  %s391_s27 = smov 8  }
   0x5   :  { %38 = dma.hbm_to_vmem [thread:$0]  %s31_s20, 2048, %s33_s22, [#allocation7], %s390_s26, %s390_s26, %s391_s27  }
   0x6   :  { %s392_s28 = smov [#allocation3]   ;;  %s45_s1 = sshll.u32 %s458_s3, 4  ;;  %s46_s1 = int_to_ptr.hbm [resolvable:$true] %s45_s1 }
   0x7   :  { %s19_s29 = sshll.u32 %s392_s28, 4  ;;  %s393_s0 = smov [#allocation8]   ;;  %s20_s29 = int_to_ptr.vmem [resolvable:$true] %s19_s29 }
   0x8   :  { %25 = dma.hbm_to_vmem [thread:$0]  %s18_s25, 256, %s20_s29, [#allocation4], %s390_s26, %s390_s26, %s391_s27  }
   0x9   :  { %s47_s7 = sshll.u32 %s393_s0, 4  ;;  %s48_s7 = int_to_ptr.vmem [resolvable:$true] %s47_s7 }
   0xa   :  { %53 = dma.hbm_to_vmem [thread:$0]  %s46_s1, 2048, %s48_s7, [#allocation7], %s390_s26, %s390_s26, %s391_s27  }
   0xb   :  { %383 = dma.done.wait [#allocation4], 256  }
   0xc   :  { %384 = vsyncadd [#allocation4], 4294967040 }
   0xd   :  { %385 = dma.done.wait [#allocation7], 4096  }
   0xe   :  { %386 = vsyncadd [#allocation7], 4294963200  ;;  %v93_v0 = vld [vmem:[#allocation6 + $0x78] sm:$0xff]  ;;  %v92_v1 = vld [vmem:[#allocation6 + $0x70] sm:$0xff]  ;;  %s394_s10 = smov [#allocation9]   ;;  %s223_s14 = sshll.u32 %s460_s5, 4  ;;  %s224_s14 = int_to_ptr.hbm [resolvable:$true] %s223_s14 }
   0xf   :  { %94 = vmatpush.msra.mxu0 %v93_v0  ;;  %239 = vmatpush.msra.mxu2 %v93_v0  ;;  %v91_v2 = vld [vmem:[#allocation6 + $0x68] sm:$0xff]  ;;  %v90_v3 = vld [vmem:[#allocation6 + $0x60] sm:$0xff]  ;;  %v89_v4 = vld [vmem:[#allocation6 + $0x58] sm:$0xff]  ;;  %s221_s11 = sshll.u32 %s394_s10, 4  ;;  %s222_s11 = int_to_ptr.vmem [resolvable:$true] %s221_s11 }
  0x10   :  { %v88_v5 = vld [vmem:[#allocation6 + $0x50] sm:$0xff]  ;;  %v87_v6 = vld [vmem:[#allocation6 + $0x48] sm:$0xff]  ;;  %v86_v7 = vld [vmem:[#allocation6 + $0x40] sm:$0xff] }
  0x11   :  { %95 = vmatpush.msra.mxu0 %v92_v1  ;;  %240 = vmatpush.msra.mxu2 %v92_v1  ;;  %v85_v8 = vld [vmem:[#allocation6 + $0x38] sm:$0xff]  ;;  %v84_v9 = vld [vmem:[#allocation6 + $0x30] sm:$0xff]  ;;  %v83_v10 = vld [vmem:[#allocation6 + $0x28] sm:$0xff] }
  0x12   :  { %v82_v11 = vld [vmem:[#allocation6 + $0x20] sm:$0xff]  ;;  %v81_v12 = vld [vmem:[#allocation6 + $0x18] sm:$0xff]  ;;  %v80_v13 = vld [vmem:[#allocation6 + $0x10] sm:$0xff] }
  0x13   :  { %96 = vmatpush.msra.mxu0 %v91_v2  ;;  %241 = vmatpush.msra.mxu2 %v91_v2  ;;  %v79_v14 = vld [vmem:[#allocation6 + $0x8] sm:$0xff]  ;;  %v78_v15 = vld [vmem:[#allocation6] sm:$0xff]  ;;  %v76_v16 = vld [vmem:[#allocation3] sm:$0xff] }
  0x14   :  { %v77_v17 = vld [vmem:[#allocation3 + $0x8] sm:$0xff]  ;;  %v186_v19 = vld [vmem:[#allocation8 + $0x70] sm:$0xff]  ;;  %v185_v20 = vld [vmem:[#allocation8 + $0x68] sm:$0xff] }
  0x15   :  { %97 = vmatpush.msra.mxu0 %v90_v3  ;;  %242 = vmatpush.msra.mxu2 %v90_v3  ;;  %v187_v18 = vld [vmem:[#allocation8 + $0x78] sm:$0xff]  ;;  %v184_v21 = vld [vmem:[#allocation8 + $0x60] sm:$0xff]  ;;  %v182_v23 = vld [vmem:[#allocation8 + $0x50] sm:$0xff] }
  0x16   :  { %192 = vmatpush.msra.mxu1 %v187_v18  ;;  %255 = vmatpush.msra.mxu3 %v187_v18  ;;  %v183_v22 = vld [vmem:[#allocation8 + $0x58] sm:$0xff]  ;;  %v181_v24 = vld [vmem:[#allocation8 + $0x48] sm:$0xff]  ;;  %v180_v25 = vld [vmem:[#allocation8 + $0x40] sm:$0xff] }
  0x17   :  { %98 = vmatpush.msra.mxu0 %v89_v4  ;;  %243 = vmatpush.msra.mxu2 %v89_v4  ;;  %v179_v26 = vld [vmem:[#allocation8 + $0x38] sm:$0xff]  ;;  %v178_v27 = vld [vmem:[#allocation8 + $0x30] sm:$0xff]  ;;  %v177_v28 = vld [vmem:[#allocation8 + $0x28] sm:$0xff] }
  0x18   :  { %193 = vmatpush.msra.mxu1 %v186_v19  ;;  %256 = vmatpush.msra.mxu3 %v186_v19  ;;  %v176_v29 = vld [vmem:[#allocation8 + $0x20] sm:$0xff]  ;;  %v175_v30 = vld [vmem:[#allocation8 + $0x18] sm:$0xff]  ;;  %v174_v31 = vld [vmem:[#allocation8 + $0x10] sm:$0xff] }
  0x19   :  { %99 = vmatpush.msra.mxu0 %v88_v5  ;;  %244 = vmatpush.msra.mxu2 %v88_v5  ;;  %v173_v32 = vld [vmem:[#allocation8 + $0x8] sm:$0xff]  ;;  %v277_v33 = vld [vmem:[%s457_s2] ss:$0 sm:$0xff]  ;;  %v172_v34 = vld [vmem:[#allocation8] sm:$0xff] }
  0x1a   :  { %194 = vmatpush.msra.mxu1 %v185_v20  ;;  %257 = vmatpush.msra.mxu3 %v185_v20  ;;  %v278_v3 = vld [vmem:[%s459_s4] ss:$0 sm:$0xff] }
  0x1b   :  { %100 = vmatpush.msra.mxu0 %v87_v6  ;;  %245 = vmatpush.msra.mxu2 %v87_v6 }
  0x1c   :  { %195 = vmatpush.msra.mxu1 %v184_v21  ;;  %258 = vmatpush.msra.mxu3 %v184_v21 }
  0x1d   :  { %101 = vmatpush.msra.mxu0 %v86_v7  ;;  %246 = vmatpush.msra.mxu2 %v86_v7 }
  0x1e   :  { %196 = vmatpush.msra.mxu1 %v183_v22  ;;  %259 = vmatpush.msra.mxu3 %v183_v22 }
  0x1f   :  { %102 = vmatpush.msra.mxu0 %v85_v8  ;;  %247 = vmatpush.msra.mxu2 %v85_v8 }
  0x20   :  { %197 = vmatpush.msra.mxu1 %v182_v23  ;;  %260 = vmatpush.msra.mxu3 %v182_v23 }
  0x21   :  { %103 = vmatpush.msra.mxu0 %v84_v9  ;;  %248 = vmatpush.msra.mxu2 %v84_v9 }
  0x22   :  { %198 = vmatpush.msra.mxu1 %v181_v24  ;;  %261 = vmatpush.msra.mxu3 %v181_v24 }
  0x23   :  { %104 = vmatpush.msra.mxu0 %v83_v10  ;;  %249 = vmatpush.msra.mxu2 %v83_v10 }
  0x24   :  { %199 = vmatpush.msra.mxu1 %v180_v25  ;;  %262 = vmatpush.msra.mxu3 %v180_v25 }
  0x25   :  { %105 = vmatpush.msra.mxu0 %v82_v11  ;;  %250 = vmatpush.msra.mxu2 %v82_v11 }
  0x26   :  { %200 = vmatpush.msra.mxu1 %v179_v26  ;;  %263 = vmatpush.msra.mxu3 %v179_v26 }
  0x27   :  { %106 = vmatpush.msra.mxu0 %v81_v12  ;;  %251 = vmatpush.msra.mxu2 %v81_v12 }
  0x28   :  { %201 = vmatpush.msra.mxu1 %v178_v27  ;;  %264 = vmatpush.msra.mxu3 %v178_v27 }
  0x29   :  { %107 = vmatpush.msra.mxu0 %v80_v13  ;;  %252 = vmatpush.msra.mxu2 %v80_v13 }
  0x2a   :  { %202 = vmatpush.msra.mxu1 %v177_v28  ;;  %265 = vmatpush.msra.mxu3 %v177_v28 }
  0x2b   :  { %108 = vmatpush.msra.mxu0 %v79_v14  ;;  %253 = vmatpush.msra.mxu2 %v79_v14 }
  0x2c   :  { %203 = vmatpush.msra.mxu1 %v176_v29  ;;  %266 = vmatpush.msra.mxu3 %v176_v29 }
  0x2d   :  { %109 = vmatpush.msra.mxu0 %v78_v15  ;;  %254 = vmatpush.msra.mxu2 %v78_v15 }
  0x2e   :  { %110 = vmatmul.f32.vlgmr.msra.gmra.mxu0 %v76_v16  ;;  %113 = vmatmul.f32.vlgmr.msra.gmra.mxu2 %v77_v17 }
  0x2f   :  { %204 = vmatpush.msra.mxu1 %v175_v30  ;;  %267 = vmatpush.msra.mxu3 %v175_v30 }
  0x31   :  { %205 = vmatpush.msra.mxu1 %v174_v31  ;;  %268 = vmatpush.msra.mxu3 %v174_v31 }
  0x33   :  { %206 = vmatpush.msra.mxu1 %v173_v32  ;;  %269 = vmatpush.msra.mxu3 %v173_v32 }
  0x35   :  { %207 = vmatpush.msra.mxu1 %v172_v34  ;;  %270 = vmatpush.msra.mxu3 %v172_v34 }
  0xab   :  { %v111_v35 = vpop.f32.mrf.mxu0 }
  0xac   :  { %v130_v36 = vadd.f32 %v277_v33, %v111_v35 }
  0xae   :  { %v237_v37 = vmul.f32 -1.442695, %v130_v36 }
  0xb0   :  { %279 = vpow2.f32 %v237_v37 }
  0xb1   :  { %v114_v38 = vpop.f32.mrf.mxu2 }
  0xb2   :  { %v131_v39 = vadd.f32 %v277_v33, %v114_v38 }
  0xb4   :  { %v238_v40 = vmul.f32 -1.442695, %v131_v39 }
  0xb6   :  { %v280_v41 = vpop.eup %279  ;;  %281 = vpow2.f32 %v238_v40 }
  0xb7   :  { %v138_v42 = vadd.f32 1.0, %v280_v41 }
  0xb9   :  { %283 = vrcp.f32 %v138_v42  ;;  %v151_v47 = vand.u32 2147483648, %v138_v42  ;;  %vm145_vm0 = vweird.f32 %v138_v42  ;;  %v149_v49 = vand.u32 2147483647, %v138_v42 }
  0xbb   :  { %v152_v52 = vor.u32 1.1754944e-38, %v151_v47  ;;  %vm150_vm3 = vcmp.eq.f32.partialorder %v149_v49, 8.507059e+37 }
  0xbc   :  { %v282_v43 = vpop.eup %281 }
  0xbd   :  { %v139_v44 = vadd.f32 1.0, %v282_v43 }
  0xbf   :  { %v284_v45 = vpop.eup %283  ;;  %285 = vrcp.f32 %v139_v44  ;;  %v166_v58 = vand.u32 2147483648, %v139_v44  ;;  %v164_v61 = vand.u32 2147483647, %v139_v44  ;;  %vm160_vm5 = vweird.f32 %v139_v44 }
  0xc0   :  { %v141_v46 = vmul.f32 %v284_v45, %v138_v42  ;;  %vm146_vm1 = vweird.f32 %v284_v45 }
  0xc1   :  { %vm147_vm2 = vmor %vm145_vm0, %vm146_vm1  ;;  %v167_v63 = vor.u32 1.1754944e-38, %v166_v58  ;;  %vm165_vm7 = vcmp.eq.f32.partialorder %v164_v61, 8.507059e+37 }
  0xc2   :  { %v142_v48 = vsub.f32 1.0, %v141_v46 }
  0xc4   :  { %v143_v50 = vmul.f32 %v284_v45, %v142_v48 }
  0xc5   :  { %v286_v51 = vpop.eup %285 }
  0xc6   :  { %v144_v53 = vadd.f32 %v284_v45, %v143_v50  ;;  %v156_v54 = vmul.f32 %v286_v51, %v139_v44  ;;  %vm161_vm4 = vweird.f32 %v286_v51 }
  0xc7   :  { %vm162_vm6 = vmor %vm160_vm5, %vm161_vm4 }
  0xc8   :  { %v148_v55 = vsel %vm147_vm2, %v284_v45, %v144_v53  ;;  %v157_v56 = vsub.f32 1.0, %v156_v54 }
  0xc9   :  { %v153_v57 = vsel %vm150_vm3, %v152_v52, %v148_v55 }
  0xca   :  { %v170_v59 = vmul.f32 %v153_v57, %v130_v36  ;;  %v158_v60 = vmul.f32 %v286_v51, %v157_v56 }
  0xcc   :  { %208 = vmatmul.f32.vlgmr.msra.gmra.mxu1 %v170_v59  ;;  %v159_v62 = vadd.f32 %v286_v51, %v158_v60 }
  0xce   :  { %v163_v0 = vsel %vm162_vm6, %v286_v51, %v159_v62 }
  0xcf   :  { %v168_v1 = vsel %vm165_vm7, %v167_v63, %v163_v0 }
  0xd0   :  { %v171_v2 = vmul.f32 %v168_v1, %v131_v39 }
  0xd2   :  { %211 = vmatmul.f32.vlgmr.msra.gmra.mxu3 %v171_v2 }
 0x149   :  { %v209_v4 = vpop.f32.mrf.mxu1 }
 0x14a   :  { %v210_v5 = vadd.f32 %v278_v3, %v209_v4 }
 0x14c   :  { %215 = vst [vmem:[#allocation9] sm:$0xff] %v210_v5 }
 0x155   :  { %v212_v6 = vpop.f32.mrf.mxu3 }
 0x156   :  { %v213_v7 = vadd.f32 %v278_v3, %v212_v6 }
 0x158   :  { %216 = vst [vmem:[#allocation9 + $0x8] sm:$0xff] %v213_v7 }
 0x159   :  { %229 = dma.vmem_to_hbm [thread:$0]  %s222_s11, 256, %s224_s14, [#allocation5], %s390_s26, %s390_s26, %s391_s27  }
 0x15a   :  { %387 = dma.done.wait [#allocation5], 256  }
 0x15b   :  { %388 = vsyncadd [#allocation5], 4294967040 }
 0x15c   :  { %234 = vsyncpa [#allocation4], 1 }
 0x15d   :  { %235 = vsyncpa [#allocation7], 1 }
 0x15e   :  { %236 = vsyncpa [#allocation5], 1 }

// kernel: tpu_custom_call.1
= control target key start
LH: loop header
LB: loop body
LE: loop exit
PB: predicated region body
PF: predicated region fallthrough
CT: control target
= control target key end

     0   :  { %10 = vsyncpa [#allocation4], 0  ;;  %s455_s0 = inlined_call_operand.hbm [shape: f32[16,128], index: 0, kind: input, shape index: {}]   ;;  %s456_s1 = inlined_call_operand.hbm [shape: f32[128,128], index: 1, kind: input, shape index: {}]   ;;  %s457_s2 = inlined_call_operand.vmem [shape: f32[1,128], index: 2, kind: input, shape index: {}]   ;;  %s458_s3 = inlined_call_operand.hbm [shape: f32[128,128], index: 3, kind: input, shape index: {}]   ;;  %s459_s4 = inlined_call_operand.vmem [shape: f32[1,128], index: 4, kind: input, shape index: {}]   ;;  %s460_s5 = inlined_call_operand.hbm [shape: f32[16,128], index: 5, kind: output, shape index: {}]  }
   0x1   :  { %11 = vsyncpa [#allocation7], 0 }
   0x2   :  { %12 = vsyncpa [#allocation5], 0  ;;  %s30_s20 = sshll.u32 %s456_s1, 4  ;;  %s389_s21 = smov [#allocation6]   ;;  %s31_s20 = int_to_ptr.hbm [resolvable:$true] %s30_s20 }
   0x3   :  { %s32_s22 = sshll.u32 %s389_s21, 4  ;;  %s17_s25 = sshll.u32 %s455_s0, 4  ;;  %s33_s22 = int_to_ptr.vmem [resolvable:$true] %s32_s22  ;;  %s18_s25 = int_to_ptr.hbm [resolvable:$true] %s17_s25 }
   0x4   :  { %s390_s26 = smov 128   ;;  %s391_s27 = smov 8  }
   0x5   :  { %38 = dma.hbm_to_vmem [thread:$0]  %s31_s20, 2048, %s33_s22, [#allocation7], %s390_s26, %s390_s26, %s391_s27  }
   0x6   :  { %s392_s28 = smov [#allocation3]   ;;  %s45_s1 = sshll.u32 %s458_s3, 4  ;;  %s46_s1 = int_to_ptr.hbm [resolvable:$true] %s45_s1 }
   0x7   :  { %s19_s29 = sshll.u32 %s392_s28, 4  ;;  %s393_s0 = smov [#allocation8]   ;;  %s20_s29 = int_to_ptr.vmem [resolvable:$true] %s19_s29 }
   0x8   :  { %25 = dma.hbm_to_vmem [thread:$0]  %s18_s25, 256, %s20_s29, [#allocation4], %s390_s26, %s390_s26, %s391_s27  }
   0x9   :  { %s47_s7 = sshll.u32 %s393_s0, 4  ;;  %s48_s7 = int_to_ptr.vmem [resolvable:$true] %s47_s7 }
   0xa   :  { %53 = dma.hbm_to_vmem [thread:$0]  %s46_s1, 2048, %s48_s7, [#allocation7], %s390_s26, %s390_s26, %s391_s27  }
   0xb   :  { %383 = dma.done.wait [#allocation4], 256  }
   0xc   :  { %384 = vsyncadd [#allocation4], 4294967040 }
   0xd   :  { %385 = dma.done.wait [#allocation7], 4096  }
   0xe   :  { %386 = vsyncadd [#allocation7], 4294963200  ;;  %v93_v0 = vld [vmem:[#allocation6 + $0x78] sm:$0xff]  ;;  %v92_v1 = vld [vmem:[#allocation6 + $0x70] sm:$0xff]  ;;  %s394_s10 = smov [#allocation9]   ;;  %s223_s14 = sshll.u32 %s460_s5, 4  ;;  %s224_s14 = int_to_ptr.hbm [resolvable:$true] %s223_s14 }
   0xf   :  { %94 = vmatpush.msra.mxu0 %v93_v0  ;;  %239 = vmatpush.msra.mxu2 %v93_v0  ;;  %v91_v2 = vld [vmem:[#allocation6 + $0x68] sm:$0xff]  ;;  %v90_v3 = vld [vmem:[#allocation6 + $0x60] sm:$0xff]  ;;  %v89_v4 = vld [vmem:[#allocation6 + $0x58] sm:$0xff]  ;;  %s221_s11 = sshll.u32 %s394_s10, 4  ;;  %s222_s11 = int_to_ptr.vmem [resolvable:$true] %s221_s11 }
  0x10   :  { %v88_v5 = vld [vmem:[#allocation6 + $0x50] sm:$0xff]  ;;  %v87_v6 = vld [vmem:[#allocation6 + $0x48] sm:$0xff]  ;;  %v86_v7 = vld [vmem:[#allocation6 + $0x40] sm:$0xff] }
  0x11   :  { %95 = vmatpush.msra.mxu0 %v92_v1  ;;  %240 = vmatpush.msra.mxu2 %v92_v1  ;;  %v85_v8 = vld [vmem:[#allocation6 + $0x38] sm:$0xff]  ;;  %v84_v9 = vld [vmem:[#allocation6 + $0x30] sm:$0xff]  ;;  %v83_v10 = vld [vmem:[#allocation6 + $0x28] sm:$0xff] }
  0x12   :  { %v82_v11 = vld [vmem:[#allocation6 + $0x20] sm:$0xff]  ;;  %v81_v12 = vld [vmem:[#allocation6 + $0x18] sm:$0xff]  ;;  %v80_v13 = vld [vmem:[#allocation6 + $0x10] sm:$0xff] }
  0x13   :  { %96 = vmatpush.msra.mxu0 %v91_v2  ;;  %241 = vmatpush.msra.mxu2 %v91_v2  ;;  %v79_v14 = vld [vmem:[#allocation6 + $0x8] sm:$0xff]  ;;  %v78_v15 = vld [vmem:[#allocation6] sm:$0xff]  ;;  %v76_v16 = vld [vmem:[#allocation3] sm:$0xff] }
  0x14   :  { %v77_v17 = vld [vmem:[#allocation3 + $0x8] sm:$0xff]  ;;  %v186_v19 = vld [vmem:[#allocation8 + $0x70] sm:$0xff]  ;;  %v185_v20 = vld [vmem:[#allocation8 + $0x68] sm:$0xff] }
  0x15   :  { %97 = vmatpush.msra.mxu0 %v90_v3  ;;  %242 = vmatpush.msra.mxu2 %v90_v3  ;;  %v187_v18 = vld [vmem:[#allocation8 + $0x78] sm:$0xff]  ;;  %v184_v21 = vld [vmem:[#allocation8 + $0x60] sm:$0xff]  ;;  %v182_v23 = vld [vmem:[#allocation8 + $0x50] sm:$0xff] }
  0x16   :  { %192 = vmatpush.msra.mxu1 %v187_v18  ;;  %255 = vmatpush.msra.mxu3 %v187_v18  ;;  %v183_v22 = vld [vmem:[#allocation8 + $0x58] sm:$0xff]  ;;  %v181_v24 = vld [vmem:[#allocation8 + $0x48] sm:$0xff]  ;;  %v180_v25 = vld [vmem:[#allocation8 + $0x40] sm:$0xff] }
  0x17   :  { %98 = vmatpush.msra.mxu0 %v89_v4  ;;  %243 = vmatpush.msra.mxu2 %v89_v4  ;;  %v179_v26 = vld [vmem:[#allocation8 + $0x38] sm:$0xff]  ;;  %v178_v27 = vld [vmem:[#allocation8 + $0x30] sm:$0xff]  ;;  %v177_v28 = vld [vmem:[#allocation8 + $0x28] sm:$0xff] }
  0x18   :  { %193 = vmatpush.msra.mxu1 %v186_v19  ;;  %256 = vmatpush.msra.mxu3 %v186_v19  ;;  %v176_v29 = vld [vmem:[#allocation8 + $0x20] sm:$0xff]  ;;  %v175_v30 = vld [vmem:[#allocation8 + $0x18] sm:$0xff]  ;;  %v174_v31 = vld [vmem:[#allocation8 + $0x10] sm:$0xff] }
  0x19   :  { %99 = vmatpush.msra.mxu0 %v88_v5  ;;  %244 = vmatpush.msra.mxu2 %v88_v5  ;;  %v173_v32 = vld [vmem:[#allocation8 + $0x8] sm:$0xff]  ;;  %v277_v33 = vld [vmem:[%s457_s2] ss:$0 sm:$0xff]  ;;  %v172_v34 = vld [vmem:[#allocation8] sm:$0xff] }
  0x1a   :  { %194 = vmatpush.msra.mxu1 %v185_v20  ;;  %257 = vmatpush.msra.mxu3 %v185_v20  ;;  %v278_v3 = vld [vmem:[%s459_s4] ss:$0 sm:$0xff] }
  0x1b   :  { %100 = vmatpush.msra.mxu0 %v87_v6  ;;  %245 = vmatpush.msra.mxu2 %v87_v6 }
  0x1c   :  { %195 = vmatpush.msra.mxu1 %v184_v21  ;;  %258 = vmatpush.msra.mxu3 %v184_v21 }
  0x1d   :  { %101 = vmatpush.msra.mxu0 %v86_v7  ;;  %246 = vmatpush.msra.mxu2 %v86_v7 }
  0x1e   :  { %196 = vmatpush.msra.mxu1 %v183_v22  ;;  %259 = vmatpush.msra.mxu3 %v183_v22 }
  0x1f   :  { %102 = vmatpush.msra.mxu0 %v85_v8  ;;  %247 = vmatpush.msra.mxu2 %v85_v8 }
  0x20   :  { %197 = vmatpush.msra.mxu1 %v182_v23  ;;  %260 = vmatpush.msra.mxu3 %v182_v23 }
  0x21   :  { %103 = vmatpush.msra.mxu0 %v84_v9  ;;  %248 = vmatpush.msra.mxu2 %v84_v9 }
  0x22   :  { %198 = vmatpush.msra.mxu1 %v181_v24  ;;  %261 = vmatpush.msra.mxu3 %v181_v24 }
  0x23   :  { %104 = vmatpush.msra.mxu0 %v83_v10  ;;  %249 = vmatpush.msra.mxu2 %v83_v10 }
  0x24   :  { %199 = vmatpush.msra.mxu1 %v180_v25  ;;  %262 = vmatpush.msra.mxu3 %v180_v25 }
  0x25   :  { %105 = vmatpush.msra.mxu0 %v82_v11  ;;  %250 = vmatpush.msra.mxu2 %v82_v11 }
  0x26   :  { %200 = vmatpush.msra.mxu1 %v179_v26  ;;  %263 = vmatpush.msra.mxu3 %v179_v26 }
  0x27   :  { %106 = vmatpush.msra.mxu0 %v81_v12  ;;  %251 = vmatpush.msra.mxu2 %v81_v12 }
  0x28   :  { %201 = vmatpush.msra.mxu1 %v178_v27  ;;  %264 = vmatpush.msra.mxu3 %v178_v27 }
  0x29   :  { %107 = vmatpush.msra.mxu0 %v80_v13  ;;  %252 = vmatpush.msra.mxu2 %v80_v13 }
  0x2a   :  { %202 = vmatpush.msra.mxu1 %v177_v28  ;;  %265 = vmatpush.msra.mxu3 %v177_v28 }
  0x2b   :  { %108 = vmatpush.msra.mxu0 %v79_v14  ;;  %253 = vmatpush.msra.mxu2 %v79_v14 }
  0x2c   :  { %203 = vmatpush.msra.mxu1 %v176_v29  ;;  %266 = vmatpush.msra.mxu3 %v176_v29 }
  0x2d   :  { %109 = vmatpush.msra.mxu0 %v78_v15  ;;  %254 = vmatpush.msra.mxu2 %v78_v15 }
  0x2e   :  { %110 = vmatmul.f32.vlgmr.msra.gmra.mxu0 %v76_v16  ;;  %113 = vmatmul.f32.vlgmr.msra.gmra.mxu2 %v77_v17 }
  0x2f   :  { %204 = vmatpush.msra.mxu1 %v175_v30  ;;  %267 = vmatpush.msra.mxu3 %v175_v30 }
  0x31   :  { %205 = vmatpush.msra.mxu1 %v174_v31  ;;  %268 = vmatpush.msra.mxu3 %v174_v31 }
  0x33   :  { %206 = vmatpush.msra.mxu1 %v173_v32  ;;  %269 = vmatpush.msra.mxu3 %v173_v32 }
  0x35   :  { %207 = vmatpush.msra.mxu1 %v172_v34  ;;  %270 = vmatpush.msra.mxu3 %v172_v34 }
  0xab   :  { %v111_v35 = vpop.f32.mrf.mxu0 }
  0xac   :  { %v130_v36 = vadd.f32 %v277_v33, %v111_v35 }
  0xae   :  { %v237_v37 = vmul.f32 -1.442695, %v130_v36 }
  0xb0   :  { %279 = vpow2.f32 %v237_v37 }
  0xb1   :  { %v114_v38 = vpop.f32.mrf.mxu2 }
  0xb2   :  { %v131_v39 = vadd.f32 %v277_v33, %v114_v38 }
  0xb4   :  { %v238_v40 = vmul.f32 -1.442695, %v131_v39 }
  0xb6   :  { %v280_v41 = vpop.eup %279  ;;  %281 = vpow2.f32 %v238_v40 }
  0xb7   :  { %v138_v42 = vadd.f32 1.0, %v280_v41 }
  0xb9   :  { %283 = vrcp.f32 %v138_v42  ;;  %v151_v47 = vand.u32 2147483648, %v138_v42  ;;  %vm145_vm0 = vweird.f32 %v138_v42  ;;  %v149_v49 = vand.u32 2147483647, %v138_v42 }
  0xbb   :  { %v152_v52 = vor.u32 1.1754944e-38, %v151_v47  ;;  %vm150_vm3 = vcmp.eq.f32.partialorder %v149_v49, 8.507059e+37 }
  0xbc   :  { %v282_v43 = vpop.eup %281 }
  0xbd   :  { %v139_v44 = vadd.f32 1.0, %v282_v43 }
  0xbf   :  { %v284_v45 = vpop.eup %283  ;;  %285 = vrcp.f32 %v139_v44  ;;  %v166_v58 = vand.u32 2147483648, %v139_v44  ;;  %v164_v61 = vand.u32 2147483647, %v139_v44  ;;  %vm160_vm5 = vweird.f32 %v139_v44 }
  0xc0   :  { %v141_v46 = vmul.f32 %v284_v45, %v138_v42  ;;  %vm146_vm1 = vweird.f32 %v284_v45 }
  0xc1   :  { %vm147_vm2 = vmor %vm145_vm0, %vm146_vm1  ;;  %v167_v63 = vor.u32 1.1754944e-38, %v166_v58  ;;  %vm165_vm7 = vcmp.eq.f32.partialorder %v164_v61, 8.507059e+37 }
  0xc2   :  { %v142_v48 = vsub.f32 1.0, %v141_v46 }
  0xc4   :  { %v143_v50 = vmul.f32 %v284_v45, %v142_v48 }
  0xc5   :  { %v286_v51 = vpop.eup %285 }
  0xc6   :  { %v144_v53 = vadd.f32 %v284_v45, %v143_v50  ;;  %v156_v54 = vmul.f32 %v286_v51, %v139_v44  ;;  %vm161_vm4 = vweird.f32 %v286_v51 }
  0xc7   :  { %vm162_vm6 = vmor %vm160_vm5, %vm161_vm4 }
  0xc8   :  { %v148_v55 = vsel %vm147_vm2, %v284_v45, %v144_v53  ;;  %v157_v56 = vsub.f32 1.0, %v156_v54 }
  0xc9   :  { %v153_v57 = vsel %vm150_vm3, %v152_v52, %v148_v55 }
  0xca   :  { %v170_v59 = vmul.f32 %v153_v57, %v130_v36  ;;  %v158_v60 = vmul.f32 %v286_v51, %v157_v56 }
  0xcc   :  { %208 = vmatmul.f32.vlgmr.msra.gmra.mxu1 %v170_v59  ;;  %v159_v62 = vadd.f32 %v286_v51, %v158_v60 }
  0xce   :  { %v163_v0 = vsel %vm162_vm6, %v286_v51, %v159_v62 }
  0xcf   :  { %v168_v1 = vsel %vm165_vm7, %v167_v63, %v163_v0 }
  0xd0   :  { %v171_v2 = vmul.f32 %v168_v1, %v131_v39 }
  0xd2   :  { %211 = vmatmul.f32.vlgmr.msra.gmra.mxu3 %v171_v2 }
 0x149   :  { %v209_v4 = vpop.f32.mrf.mxu1 }
 0x14a   :  { %v210_v5 = vadd.f32 %v278_v3, %v209_v4 }
 0x14c   :  { %215 = vst [vmem:[#allocation9] sm:$0xff] %v210_v5 }
 0x155   :  { %v212_v6 = vpop.f32.mrf.mxu3 }
 0x156   :  { %v213_v7 = vadd.f32 %v278_v3, %v212_v6 }
 0x158   :  { %216 = vst [vmem:[#allocation9 + $0x8] sm:$0xff] %v213_v7 }
 0x159   :  { %229 = dma.vmem_to_hbm [thread:$0]  %s222_s11, 256, %s224_s14, [#allocation5], %s390_s26, %s390_s26, %s391_s27  }
 0x15a   :  { %387 = dma.done.wait [#allocation5], 256  }
 0x15b   :  { %388 = vsyncadd [#allocation5], 4294967040 }
 0x15c   :  { %234 = vsyncpa [#allocation4], 1 }
 0x15d   :  { %235 = vsyncpa [#allocation7], 1 }
 0x15e   :  { %236 = vsyncpa [#allocation5], 1 }

</bundles_post_ra>
